<compile_context>
chip_gen: v7x
topology: tpu7x:2x2x1
jax: 0.10.0
libtpu: 0.0.40
codegen_flags: <defaults>
</compile_context>

<pallas_src>
import jax
import jax.numpy as jnp
from jax.experimental import pallas as pl
from jax.experimental.pallas import tpu as pltpu

EMBED_DIM = 32       # embedding_dim
MAX_SEQ = 1024       # max_seq_length


def learnable_positional_forward(embedding_table, input_ids):
    """Returns embedding(position_ids[:, :S]) with shape (1, S, D)."""
    seq_len = input_ids.shape[1]
    max_seq, D = embedding_table.shape
    assert seq_len <= max_seq, "seq_len exceeds max_seq_length"

    # Zero-length edge case handled host-side: never issue a zero-row DMA.
    if seq_len == 0:
        return jnp.zeros((1, 0, D), dtype=embedding_table.dtype)

    def kernel(emb_hbm, o_hbm, sem):
        # Single HBM->HBM DMA of the first seq_len rows of the table.
        cp = pltpu.make_async_copy(
            emb_hbm.at[pl.ds(0, seq_len), :],  # (seq_len, D) prefix of the table
            o_hbm,                             # (seq_len, D) output
            sem,
        )
        cp.start()
        cp.wait()

    out = pl.pallas_call(
        kernel,
        out_shape=jax.ShapeDtypeStruct((seq_len, D), embedding_table.dtype),
        in_specs=[pl.BlockSpec(memory_space=pl.ANY)],   # raw HBM ref, no auto-DMA
        out_specs=pl.BlockSpec(memory_space=pl.ANY),    # raw HBM ref, written by DMA
        scratch_shapes=[pltpu.SemaphoreType.DMA(())],
        # Advisory hint: this call is near-free (read + write of the prefix).
        cost_estimate=pl.CostEstimate(
            flops=0,
            transcendentals=0,
            bytes_accessed=2 * seq_len * D * embedding_table.dtype.itemsize,
        ),
    )(embedding_table)

    # Add the batch-first leading dim (metadata-only reshape) to match PyTorch.
    return out[None, :, :]


if __name__ == "__main__":
    key = jax.random.PRNGKey(0)
    k_emb, k_ids = jax.random.split(key)

    # Deterministic "learned" parameters: torch.nn.Embedding default init ~ N(0,1)
    embedding_table = jax.random.normal(k_emb, (MAX_SEQ, EMBED_DIM), jnp.float32)

    # Example input_ids: batch=2, seq=8 (only its shape[1] matters)
    input_ids = jax.random.randint(k_ids, (2, 8), 0, 100, dtype=jnp.int32)

    out = learnable_positional_forward(embedding_table, input_ids)
    out = jax.block_until_ready(out)

    # Reference check: pure-JAX slice of the table
    seq_len = input_ids.shape[1]
    ref = embedding_table[:seq_len][None, :, :]
    assert out.shape == (1, seq_len, EMBED_DIM)
    assert out.dtype == jnp.float32
    assert jnp.allclose(out, ref)

    # Zero-length edge case (guarded host-side, no DMA issued)
    empty_ids = jnp.zeros((2, 0), dtype=jnp.int32)
    empty_out = jax.block_until_ready(
        learnable_positional_forward(embedding_table, empty_ids))
    assert empty_out.shape == (1, 0, EMBED_DIM)

    print("KERNEL_OK")
</pallas_src>

<mosaic_0001>
module attributes {stable_mosaic.version = 11 : i64} {
  func.func @kernel(%arg0: memref<1024x32xf32, #tpu.memory_space<any>>, %arg1: memref<8x32xf32, #tpu.memory_space<any>>, %arg2: memref<!tpu.dma_semaphore, #tpu.memory_space<semaphore_mem>>) attributes {dimension_semantics = [], scalar_prefetch = 0 : i64, scratch_operands = 1 : i64, tpu.core_type = #tpu.core_type<tc>} {
    %c0_i32 = arith.constant 0 : i32
    %c0_i32_0 = arith.constant 0 : i32
    %0 = tpu.memref_slice %arg0[%c0_i32, %c0_i32_0] : memref<1024x32xf32, #tpu.memory_space<any>> -> memref<8x32xf32, #tpu.memory_space<any>>
    tpu.enqueue_dma source(%0 : memref<8x32xf32, #tpu.memory_space<any>>) target(%arg1 : memref<8x32xf32, #tpu.memory_space<any>>) target_semaphore(%arg2 : memref<!tpu.dma_semaphore, #tpu.memory_space<semaphore_mem>>)
    %c0_i32_1 = arith.constant 0 : i32
    %c0_i32_2 = arith.constant 0 : i32
    %1 = tpu.memref_slice %arg0[%c0_i32_1, %c0_i32_2] : memref<1024x32xf32, #tpu.memory_space<any>> -> memref<8x32xf32, #tpu.memory_space<any>>
    tpu.wait_dma2 semaphore(%arg2 : memref<!tpu.dma_semaphore, #tpu.memory_space<semaphore_mem>>) src(%1 : memref<8x32xf32, #tpu.memory_space<any>>) dst(%arg1 : memref<8x32xf32, #tpu.memory_space<any>>)
    return
  }
}

</mosaic_0001>

<bundles_post_ra>
// kernel: tpu_custom_call.1
= control target key start
LH: loop header
LB: loop body
LE: loop exit
PB: predicated region body
PF: predicated region fallthrough
CT: control target
= control target key end

     0   :  { %s76_s0 = inlined_call_operand.vmem [shape: f32[1024,32], index: 0, kind: input, shape index: {}]   ;;  %s77_s1 = inlined_call_operand.hbm [shape: f32[8,32], index: 1, kind: output, shape index: {}]  }
   0x1   :  { %s13_s8 = sshll.u32 %s76_s0, 4  ;;  %s14_s8 = int_to_ptr.vmem [resolvable:$true] %s13_s8 }
   0x2   :  { %s27_s9 = scalar_lea.vmem %s14_s8, 128  ;;  %s31_s10 = scalar_lea.vmem %s14_s8, 16384 }
   0x3   :  { %p28_p0 = scmp.ne.s32.totalorder %s14_s8, %s27_s9  ;;  %p32_p1 = scmp.lt.s32.totalorder %s14_s8, %s14_s8 }
   0x4   :  { %p33_p2 = scmp.lt.s32.totalorder %s31_s10, %s27_s9 }
   0x6   :  { %p34_p3 = por %p33_p2, %p32_p1 }
   0x8   :  { %p35_p4 = pnand %p34_p3, %p28_p0 }
   0xa   :  { %38 = shalt.err (!%p35_p4)  }
   0xb   :  { %s39_s13 = scalar_lea.hbm %s77_s1, 128 }
   0xc   :  { %p40_p5 = scmp.ne.s32.totalorder %s77_s1, %s39_s13  ;;  %p43_p6 = scmp.lt.u32.totalorder %s39_s13, %s77_s1 }
   0xe   :  { %p45_p7 = pnand %p43_p6, %p40_p5 }
  0x10   :  { %48 = shalt.err (!%p45_p7)  }
  0x11   :  { %16 = dma.vmem_to_hbm [thread:$0]  %s14_s8, 128, %s77_s1, [#allocation2] }
  0x12   :  { %49 = dma.done.wait [#allocation2], 128 }
  0x13   :  { %50 = vsyncadd [#allocation2], 4294967168 }
  0x14   :  { %20 = vsyncmov [#allocation2] }
  0x17   :  { %s21_s19 = vpop.sfrf %20 }
  0x18   :  { %p26_p8 = scmp.ne.s32.totalorder %s21_s19, 0 }
  0x1a   :  { %25 = shalt.err (%p26_p8)  }

</bundles_post_ra>
